<compile_context>
chip_gen: v7x
topology: tpu7x:2x2x1
jax: 0.10.0
libtpu: 0.0.40
codegen_flags: <defaults>
</compile_context>

<pallas_src>
import math

import jax
import jax.numpy as jnp
from jax.experimental import pallas as pl
from jax.experimental.pallas import tpu as pltpu

LANE = 128          # lane-dense padding unit for the label dimension
BATCH_TILE = 128    # batch tile used only when B is large (v7x dual-TC sharding)


def head_kernel(x_ref, w1_ref, b1_ref, w2_ref, b2_ref, o_ref):
    # x_ref : [tb, 4H]  CLS features of this batch tile (concat of last 4 layers)
    # w1_ref: [4H, H]   hl weight ([in, out])
    # b1_ref: [1, H]    hl bias
    # w2_ref: [H, LP]   last_l weight, zero-padded to LP lanes
    # b2_ref: [1, LP]   last_l bias, zero-padded
    # o_ref : [tb, LP]  lane-dense logits
    h = jnp.tanh(
        jnp.dot(x_ref[...], w1_ref[...], preferred_element_type=jnp.float32)
        + b1_ref[...]
    )
    y = jnp.dot(h, w2_ref[...], preferred_element_type=jnp.float32) + b2_ref[...]
    o_ref[...] = y.astype(o_ref.dtype)


def classifier_head(cls_feats, w1, b1, w2, b2):
    """cls_feats: [B, 4H] float32 -> logits [B, nb_labels] float32."""
    B, F4 = cls_feats.shape
    F4_w, H = w1.shape
    assert F4_w == F4, "hl weight must be [4H, H]"
    L = w2.shape[1]
    # Lane-dense output: round label dim up to a multiple of 128 lanes
    # (unmasked vst instead of masked partial stores). Sliced back after the call.
    LP = max(LANE, pl.cdiv(L, LANE) * LANE)

    w2p = jnp.pad(w2, ((0, 0), (0, LP - L)))
    b2p = jnp.pad(b2, ((0, 0), (0, LP - L)))

    # Batch sharding only when it pays off (v7x dual-TC); toy B stays one step.
    if B >= 2 * BATCH_TILE and B % BATCH_TILE == 0:
        tb = BATCH_TILE
    else:
        tb = B
    grid = (B // tb,)

    cost = pl.CostEstimate(
        flops=2 * B * F4 * H + 2 * B * H * LP,
        transcendentals=B * H,
        bytes_accessed=4 * (B * F4 + F4 * H + H + H * LP + LP + B * LP),
    )

    out = pl.pallas_call(
        head_kernel,
        out_shape=jax.ShapeDtypeStruct((B, LP), jnp.float32),
        grid_spec=pltpu.PrefetchScalarGridSpec(
            num_scalar_prefetch=0,
            grid=grid,
            in_specs=[
                pl.BlockSpec((tb, F4), lambda i: (i, 0)),
                pl.BlockSpec((F4, H), lambda i: (0, 0)),
                pl.BlockSpec((1, H), lambda i: (0, 0)),
                pl.BlockSpec((H, LP), lambda i: (0, 0)),
                pl.BlockSpec((1, LP), lambda i: (0, 0)),
            ],
            out_specs=pl.BlockSpec((tb, LP), lambda i: (i, 0)),
        ),
        compiler_params=pltpu.CompilerParams(
            dimension_semantics=("parallel",),
        ),
        cost_estimate=cost,
    )(cls_feats, w1, b1, w2p, b2p)

    return out[:, :L]


@jax.jit
def model_classifier_forward(hidden_states, w1, b1, w2, b2):
    """Mirrors ModelClassifier.forward given the transformer's hidden_states.

    hidden_states: [num_layers_plus_1, B, S, H] — the tuple returned by the
    transformer with output_hidden_states=True, stacked.

    The CLS gather + concat of the last four hidden states happens here in the
    wrapper (cheap XLA slice/reshape, ~B*4H elements) so the Pallas kernel only
    sees the [B, 4H] feature slab; hl -> tanh -> last_l is fused in one kernel
    invocation. Dropout is identity (inference).
    """
    num_hs, B, S, H = hidden_states.shape
    # Last four layers' CLS tokens, in torch.cat order [-1, -2, -3, -4].
    cls = hidden_states[num_hs - 4 :, :, 0, :]        # [4, B, H], order [-4..-1]
    cls = cls[::-1]                                   # order [-1, -2, -3, -4]
    feats = jnp.transpose(cls, (1, 0, 2)).reshape(B, 4 * H)  # [B, 4H]
    return classifier_head(feats, w1, b1, w2, b2)


def xavier_uniform(key, fan_in, fan_out):
    a = math.sqrt(6.0 / (fan_in + fan_out))
    return jax.random.uniform(key, (fan_in, fan_out), jnp.float32, minval=-a, maxval=a)


if __name__ == "__main__":
    # Small shapes consistent with the module:
    #   hidden_size H = 32  -> hidden_dim = 4*H = 128
    #   batch B = 8, seq S = 16, num transformer layers = 4 (=> 5 hidden states)
    #   nb_labels = 4
    B, S, H, NL, LABELS = 8, 16, 32, 4, 4

    key = jax.random.PRNGKey(0)
    k_hs, k_w1, k_w2 = jax.random.split(key, 3)

    # Synthetic transformer hidden states (stand-in for tr_model output).
    hidden_states = jax.random.normal(k_hs, (NL + 1, B, S, H), jnp.float32)

    # Parameters, deterministic init matching the module's __init__:
    #   hl:      Linear(4H -> H), xavier_uniform weight, zero bias
    #   last_l:  Linear(H -> labels), xavier_uniform weight, zero bias
    w1 = xavier_uniform(k_w1, 4 * H, H)            # [4H, H]  (stored [in, out])
    b1 = jnp.zeros((1, H), jnp.float32)
    w2 = xavier_uniform(k_w2, H, LABELS)           # [H, labels]
    b2 = jnp.zeros((1, LABELS), jnp.float32)

    logits = model_classifier_forward(hidden_states, w1, b1, w2, b2)
    logits = jax.block_until_ready(logits)

    # Pure-JAX reference check of the head math.
    feats = jnp.concatenate(
        [hidden_states[-1][:, 0, :], hidden_states[-2][:, 0, :],
         hidden_states[-3][:, 0, :], hidden_states[-4][:, 0, :]], axis=-1)
    ref = jnp.tanh(feats @ w1 + b1) @ w2 + b2
    assert logits.shape == (B, LABELS)
    assert jnp.allclose(logits, ref, atol=1e-5, rtol=1e-5)

    print("KERNEL_OK")
</pallas_src>

<mosaic_0001>
module attributes {stable_mosaic.version = 11 : i64} {
  func.func @head_kernel(%arg0: i32, %arg1: memref<8x128xf32, #tpu.memory_space<vmem>>, %arg2: memref<128x32xf32, #tpu.memory_space<vmem>>, %arg3: memref<1x32xf32, #tpu.memory_space<vmem>>, %arg4: memref<32x128xf32, #tpu.memory_space<vmem>>, %arg5: memref<1x128xf32, #tpu.memory_space<vmem>>, %arg6: memref<8x128xf32, #tpu.memory_space<vmem>>) attributes {dimension_semantics = [#tpu.dimension_semantics<parallel>], iteration_bounds = array<i64: 1>, scalar_prefetch = 0 : i64, scratch_operands = 0 : i64, tpu.core_type = #tpu.core_type<tc>, window_params = [{transform_indices = @transform_0, window_bounds = array<i64: 8, 128>}, {pipeline_mode = #tpu.pipeline_mode<synchronous>, transform_indices = @transform_1, window_bounds = array<i64: 128, 32>}, {pipeline_mode = #tpu.pipeline_mode<synchronous>, transform_indices = @transform_2, window_bounds = array<i64: 1, 32>}, {pipeline_mode = #tpu.pipeline_mode<synchronous>, transform_indices = @transform_3, window_bounds = array<i64: 32, 128>}, {pipeline_mode = #tpu.pipeline_mode<synchronous>, transform_indices = @transform_4, window_bounds = array<i64: 1, 128>}, {transform_indices = @transform_5, window_bounds = array<i64: 8, 128>}]} {
    %c0 = arith.constant 0 : index
    %c0_0 = arith.constant 0 : index
    %0 = vector.load %arg1[%c0, %c0_0] : memref<8x128xf32, #tpu.memory_space<vmem>>, vector<8x128xf32>
    %c0_1 = arith.constant 0 : index
    %c0_2 = arith.constant 0 : index
    %1 = vector.load %arg2[%c0_1, %c0_2] : memref<128x32xf32, #tpu.memory_space<vmem>>, vector<128x32xf32>
    %cst = arith.constant dense<0.000000e+00> : vector<8x32xf32>
    %2 = tpu.matmul %0, %1, %cst {dimension_numbers = #tpu.dot_dimension_numbers<[1], [0], [0], [1], [0, 0, 1, 1], [], []>} : vector<8x128xf32>, vector<128x32xf32>, vector<8x32xf32> -> vector<8x32xf32>
    %c0_3 = arith.constant 0 : index
    %c0_4 = arith.constant 0 : index
    %3 = vector.load %arg3[%c0_3, %c0_4] : memref<1x32xf32, #tpu.memory_space<vmem>>, vector<1x32xf32>
    %4 = vector.broadcast %3 : vector<1x32xf32> to vector<8x32xf32>
    %5 = arith.addf %2, %4 : vector<8x32xf32>
    %6 = math.tanh %5 : vector<8x32xf32>
    %c0_5 = arith.constant 0 : index
    %c0_6 = arith.constant 0 : index
    %7 = vector.load %arg4[%c0_5, %c0_6] : memref<32x128xf32, #tpu.memory_space<vmem>>, vector<32x128xf32>
    %cst_7 = arith.constant dense<0.000000e+00> : vector<8x128xf32>
    %8 = tpu.matmul %6, %7, %cst_7 {dimension_numbers = #tpu.dot_dimension_numbers<[1], [0], [0], [1], [0, 0, 1, 1], [], []>} : vector<8x32xf32>, vector<32x128xf32>, vector<8x128xf32> -> vector<8x128xf32>
    %c0_8 = arith.constant 0 : index
    %c0_9 = arith.constant 0 : index
    %9 = vector.load %arg5[%c0_8, %c0_9] : memref<1x128xf32, #tpu.memory_space<vmem>>, vector<1x128xf32>
    %10 = vector.broadcast %9 : vector<1x128xf32> to vector<8x128xf32>
    %11 = arith.addf %8, %10 : vector<8x128xf32>
    %c0_10 = arith.constant 0 : index
    %c0_11 = arith.constant 0 : index
    %12 = vector.load %arg6[%c0_10, %c0_11] : memref<8x128xf32, #tpu.memory_space<vmem>>, vector<8x128xf32>
    tpu.vector_store %arg6[%c0_10, %c0_11], %11 {strides = array<i32>} : memref<8x128xf32, #tpu.memory_space<vmem>>, vector<8x128xf32>,
    return
  }
  func.func @transform_0(%arg0: i32) -> (i32, i32) {
    %c0_i32 = arith.constant 0 : i32
    %c0_i32_0 = arith.constant 0 : i32
    return %arg0, %c0_i32 : i32, i32
  }
  func.func @transform_1(%arg0: i32) -> (i32, i32) {
    %c0_i32 = arith.constant 0 : i32
    %c0_i32_0 = arith.constant 0 : i32
    %c0_i32_1 = arith.constant 0 : i32
    return %c0_i32, %c0_i32_0 : i32, i32
  }
  func.func @transform_2(%arg0: i32) -> (i32, i32) {
    %c0_i32 = arith.constant 0 : i32
    %c0_i32_0 = arith.constant 0 : i32
    %c0_i32_1 = arith.constant 0 : i32
    return %c0_i32, %c0_i32_0 : i32, i32
  }
  func.func @transform_3(%arg0: i32) -> (i32, i32) {
    %c0_i32 = arith.constant 0 : i32
    %c0_i32_0 = arith.constant 0 : i32
    %c0_i32_1 = arith.constant 0 : i32
    return %c0_i32, %c0_i32_0 : i32, i32
  }
  func.func @transform_4(%arg0: i32) -> (i32, i32) {
    %c0_i32 = arith.constant 0 : i32
    %c0_i32_0 = arith.constant 0 : i32
    %c0_i32_1 = arith.constant 0 : i32
    return %c0_i32, %c0_i32_0 : i32, i32
  }
  func.func @transform_5(%arg0: i32) -> (i32, i32) {
    %c0_i32 = arith.constant 0 : i32
    %c0_i32_0 = arith.constant 0 : i32
    return %arg0, %c0_i32 : i32, i32
  }
}

</mosaic_0001>

<bundles_post_ra>
// kernel: model_classifier_forward.1
= control target key start
LH: loop header
LB: loop body
LE: loop exit
PB: predicated region body
PF: predicated region fallthrough
CT: control target
= control target key end

     0   :  { %v311_v0 = vmov 0.0|0.0   ;;  %vm312_vm0 = vmmov 0   ;;  %v313_v4 = vmov 0.0   ;;  %vm126_vm1 = vcmask 261120   ;;  %s416_s1 = inlined_call_operand.vmem [shape: f32[128,32], index: 1, kind: input, shape index: {}]   ;;  %s417_s0 = inlined_call_operand.vmem [shape: f32[8,128], index: 0, kind: input, shape index: {}]   ;;  %s418_s3 = inlined_call_operand.vmem [shape: f32[32,128], index: 3, kind: input, shape index: {}]   ;;  %s419_s2 = inlined_call_operand.vmem [shape: f32[1,32], index: 2, kind: input, shape index: {}]   ;;  %s420_s4 = inlined_call_operand.vmem [shape: f32[1,128], index: 4, kind: input, shape index: {}]   ;;  %s421_s5 = inlined_call_operand.vmem [shape: f32[8,128], index: 5, kind: output, shape index: {}]  }
   0x1   :  { %276 = vmatprep.subr.bf16.mxu0 %v311_v0  ;;  %v21_v1 = vld [vmem:[%s416_s1] sm:$0xff]  ;;  %v22_v2 = vld [vmem:[%s416_s1 + $0x8] sm:$0xff]  ;;  %v23_v3 = vld [vmem:[%s416_s1 + $0x10] sm:$0xff]  ;;  %262 = vmatprep.mubr.msk.f32.mxu0 %vm312_vm0, %v313_v4 }
   0x2   :  { %v277_v5 = vpack.c.bf16 %v22_v2, %v21_v1  ;;  %v24_v6 = vld [vmem:[%s416_s1 + $0x18] sm:$0xff]  ;;  %300 = vmatprep.subr.bf16.mxu1 %v311_v0  ;;  %273 = vmatprep.mubr.msk.f32.mxu1 %vm312_vm0, %v313_v4  ;;  %v25_v8 = vld [vmem:[%s416_s1 + $0x20] sm:$0xff]  ;;  %v26_v9 = vld [vmem:[%s416_s1 + $0x28] sm:$0xff] }
   0x3   :  { %v280_v7 = vpack.c.bf16 %v24_v6, %v23_v3  ;;  %v283_v10 = vpack.c.bf16 %v26_v9, %v25_v8  ;;  %v27_v11 = vld [vmem:[%s416_s1 + $0x30] sm:$0xff]  ;;  %v28_v12 = vld [vmem:[%s416_s1 + $0x38] sm:$0xff]  ;;  %v29_v14 = vld [vmem:[%s416_s1 + $0x40] sm:$0xff] }
   0x4   :  { %278 = vmatpush3.bf16.msra.mxu0 %v277_v5  ;;  %v286_v13 = vpack.c.bf16 %v28_v12, %v27_v11  ;;  %v30_v15 = vld [vmem:[%s416_s1 + $0x48] sm:$0xff]  ;;  %v31_v17 = vld [vmem:[%s416_s1 + $0x50] sm:$0xff]  ;;  %v32_v18 = vld [vmem:[%s416_s1 + $0x58] sm:$0xff] }
   0x5   :  { %279 = vmatprep.subr.bf16.mxu0 %v311_v0  ;;  %v289_v16 = vpack.c.bf16 %v30_v15, %v29_v14  ;;  %v292_v19 = vpack.c.bf16 %v32_v18, %v31_v17  ;;  %v33_v20 = vld [vmem:[%s416_s1 + $0x60] sm:$0xff]  ;;  %v34_v21 = vld [vmem:[%s416_s1 + $0x68] sm:$0xff]  ;;  %v35_v23 = vld [vmem:[%s416_s1 + $0x70] sm:$0xff] }
   0x6   :  { %v295_v22 = vpack.c.bf16 %v34_v21, %v33_v20  ;;  %v36_v24 = vld [vmem:[%s416_s1 + $0x78] sm:$0xff]  ;;  %v20_v26 = vld [vmem:[%s417_s0] sm:$0xff]  ;;  %v116_v28 = vld [vmem:[%s418_s3 + $0x8] sm:$0xff] }
   0x7   :  { %v298_v25 = vpack.c.bf16 %v36_v24, %v35_v23  ;;  %v115_v27 = vld [vmem:[%s418_s3] sm:$0xff]  ;;  %v117_v29 = vld [vmem:[%s418_s3 + $0x10] sm:$0xff]  ;;  %v118_v31 = vld [vmem:[%s418_s3 + $0x18] sm:$0xff] }
   0x8   :  { %281 = vmatpush3.bf16.msra.mxu0 %v280_v7  ;;  %v301_v30 = vpack.c.bf16 %v116_v28, %v115_v27  ;;  %v304_v32 = vpack.c.bf16 %v118_v31, %v117_v29  ;;  %v205_v33 = vld [vmem:[%s419_s2] ss:$0 sm:$0xff] }
   0x9   :  { %282 = vmatprep.subr.bf16.mxu0 %v311_v0  ;;  %v206_v38 = vld [vmem:[%s420_s4] ss:$0 sm:$0xff] }
   0xa   :  { %302 = vmatpush3.bf16.msra.mxu1 %v301_v30 }
   0xb   :  { %303 = vmatprep.subr.bf16.mxu1 %v311_v0 }
   0xc   :  { %284 = vmatpush3.bf16.msra.mxu0 %v283_v10 }
   0xd   :  { %285 = vmatprep.subr.bf16.mxu0 %v311_v0 }
   0xe   :  { %305 = vmatpush3.bf16.msra.mxu1 %v304_v32 }
  0x10   :  { %287 = vmatpush3.bf16.msra.mxu0 %v286_v13 }
  0x11   :  { %288 = vmatprep.subr.bf16.mxu0 %v311_v0 }
  0x14   :  { %290 = vmatpush3.bf16.msra.mxu0 %v289_v16 }
  0x15   :  { %291 = vmatprep.subr.bf16.mxu0 %v311_v0 }
  0x18   :  { %293 = vmatpush3.bf16.msra.mxu0 %v292_v19 }
  0x19   :  { %294 = vmatprep.subr.bf16.mxu0 %v311_v0 }
  0x1c   :  { %296 = vmatpush3.bf16.msra.mxu0 %v295_v22 }
  0x1d   :  { %297 = vmatprep.subr.bf16.mxu0 %v311_v0 }
  0x20   :  { %299 = vmatpush3.bf16.msra.mxu0 %v298_v25 }
  0x23   :  { %263 = vmatmul.mubr.f32.vlgmr.msra.gmra.mrb[0].mxu0 %v20_v26 }
  0xf6   :  { %v110_v34 = vpop.f32.mrb[0].mxu0 }
  0xf7   :  { %v111_v35 = vadd.f32 %v205_v33, %v110_v34  ;;  %v264_v36 = vpop.f32.mrb[1].mxu0 }
  0xf9   :  { %309 = vtanh.f32 %v111_v35 }
 0x103   :  { %v310_v37 = vpop.eup %309 }
 0x104   :  { %274 = vmatmul.mubr.msk.f32.vlgmr.msra.gmra.mrb[0].mxu1 %vm126_vm1, %v310_v37 }
 0x1d7   :  { %v196_v39 = vpop.f32.mrb[0].mxu1 }
 0x1d8   :  { %v197_v40 = vadd.f32 %v206_v38, %v196_v39  ;;  %v275_v41 = vpop.f32.mrb[1].mxu1 }
 0x1da   :  { %200 = vst [vmem:[%s421_s5] sm:$0xff] %v197_v40 }

</bundles_post_ra>
